<compile_context>
chip_gen: v7x
topology: tpu7x:2x2x1
jax: 0.10.0
libtpu: 0.0.40
codegen_flags: <defaults>
</compile_context>

<pallas_src>
import functools

import jax
import jax.numpy as jnp
from jax.experimental import pallas as pl
from jax.experimental.pallas import tpu as pltpu


# ------------------------------ tiling helpers ------------------------------

def _pick_tile(dim, target, align):
    """Largest tile <= target that divides dim and is a multiple of align;
    falls back to the full dim (always valid — block == array extent)."""
    if dim <= target:
        return dim
    t = (target // align) * align
    while t >= align:
        if dim % t == 0:
            return t
        t -= align
    return dim


def _vmem_limit(needed_bytes):
    """Generation-aware scoped-VMEM request: 2x the estimated need, at least
    the 32 MiB default, capped at ~75% of physical VMEM (≈48 MiB on v7x's
    64 MiB, ≈96 MiB on v5e/v6e's 128 MiB) to leave double-buffer headroom."""
    try:
        cap = int(pltpu.get_tpu_info().vmem_capacity_bytes)
    except Exception:  # interpret mode / older runtimes
        cap = 128 * 1024 * 1024
    cap = (cap * 3) // 4
    want = max(2 * int(needed_bytes), 32 * 1024 * 1024)
    return int(min(want, cap))


# ------------------------------ dense (tiled) -------------------------------

def _dense_kernel(x_ref, w_ref, b_ref, o_ref, acc_ref, *, activation):
    @pl.when(pl.program_id(2) == 0)
    def _():
        acc_ref[...] = jnp.zeros_like(acc_ref)

    # bf16 MXU matmul, f32 accumulation.
    acc_ref[...] += jnp.dot(x_ref[...].astype(jnp.bfloat16), w_ref[...],
                            preferred_element_type=jnp.float32)

    @pl.when(pl.program_id(2) == pl.num_programs(2) - 1)
    def _():
        y = acc_ref[...] + b_ref[...]
        if activation == "gelu":  # erf-based gelu (XLM / FlauBERT activation)
            y = 0.5 * y * (1.0 + jax.lax.erf(y * 0.7071067811865476))
        o_ref[...] = y.astype(o_ref.dtype)


def dense(x, w, b, activation=None, out_dtype=jnp.bfloat16):
    """o = act(x @ w + b).  w stored as (K, N) bf16 (PyTorch weight.T)."""
    M, K = x.shape
    K2, N = w.shape
    assert K == K2
    # bf16 activations/weights -> bigger tiles fit the same VMEM budget.
    # tn kept <= 256 (v5e MXU is 128 wide; fewer, longer K runs elsewhere).
    tm = _pick_tile(M, 512, 8)
    tn = _pick_tile(N, 256, 128)
    tk = _pick_tile(K, 512, 128)
    grid = (M // tm, N // tn, K // tk)
    out_it = jnp.dtype(out_dtype).itemsize
    needed = (2 * (tm * tk * x.dtype.itemsize + tk * tn * w.dtype.itemsize
                   + tn * 4 + tm * tn * out_it) + tm * tn * 4)
    return pl.pallas_call(
        functools.partial(_dense_kernel, activation=activation),
        out_shape=jax.ShapeDtypeStruct((M, N), out_dtype),
        grid_spec=pltpu.PrefetchScalarGridSpec(
            num_scalar_prefetch=0,
            grid=grid,
            in_specs=[pl.BlockSpec((tm, tk), lambda i, j, k: (i, k)),
                      pl.BlockSpec((tk, tn), lambda i, j, k: (k, j)),
                      pl.BlockSpec((1, tn), lambda i, j, k: (0, j))],
            out_specs=pl.BlockSpec((tm, tn), lambda i, j, k: (i, j)),
            scratch_shapes=[pltpu.VMEM((tm, tn), jnp.float32)]),
        compiler_params=pltpu.CompilerParams(
            dimension_semantics=("parallel", "parallel", "arbitrary"),
            vmem_limit_bytes=_vmem_limit(needed)),
    )(x, w, b.reshape(1, N))


# ----------------- fused dense + residual-add + LayerNorm -------------------

def _dense_add_ln_kernel(x_ref, w_ref, b_ref, r_ref, g_ref, bb_ref,
                         o_ref, acc_ref, *, eps):
    @pl.when(pl.program_id(1) == 0)
    def _():
        acc_ref[...] = jnp.zeros_like(acc_ref)

    acc_ref[...] += jnp.dot(x_ref[...].astype(jnp.bfloat16), w_ref[...],
                            preferred_element_type=jnp.float32)

    @pl.when(pl.program_id(1) == pl.num_programs(1) - 1)
    def _():
        y = acc_ref[...] + b_ref[...] + r_ref[...].astype(jnp.float32)
        mean = jnp.mean(y, axis=-1, keepdims=True)     # LN stats in f32
        var = jnp.mean((y - mean) ** 2, axis=-1, keepdims=True)
        inv = jax.lax.rsqrt(var + eps)
        o_ref[...] = (((y - mean) * inv) * g_ref[...] + bb_ref[...]).astype(o_ref.dtype)


def dense_add_layernorm(x, w, b, residual, gamma, beta, eps=1e-12,
                        out_dtype=jnp.bfloat16):
    """LayerNorm(x @ w + b + residual).  N kept whole (LN needs the full row).
    VMEM ≈ 2*(tm*tk*2 + tk*N*2 + tm*N*2[residual] + tm*N*out + 3*N*4)
           + tm*N*4[f32 accumulator]   (≈5-6 MiB at H=768, fine on all gens)."""
    M, K = x.shape
    _, N = w.shape
    tm = _pick_tile(M, 256, 8)
    tk = _pick_tile(K, 512, 128)
    grid = (M // tm, K // tk)
    out_it = jnp.dtype(out_dtype).itemsize
    needed = (2 * (tm * tk * x.dtype.itemsize + tk * N * w.dtype.itemsize
                   + tm * N * residual.dtype.itemsize + tm * N * out_it
                   + 3 * N * 4) + tm * N * 4)
    return pl.pallas_call(
        functools.partial(_dense_add_ln_kernel, eps=eps),
        out_shape=jax.ShapeDtypeStruct((M, N), out_dtype),
        grid_spec=pltpu.PrefetchScalarGridSpec(
            num_scalar_prefetch=0,
            grid=grid,
            in_specs=[pl.BlockSpec((tm, tk), lambda i, k: (i, k)),
                      pl.BlockSpec((tk, N), lambda i, k: (k, 0)),
                      pl.BlockSpec((1, N), lambda i, k: (0, 0)),
                      pl.BlockSpec((tm, N), lambda i, k: (i, 0)),
                      pl.BlockSpec((1, N), lambda i, k: (0, 0)),
                      pl.BlockSpec((1, N), lambda i, k: (0, 0))],
            out_specs=pl.BlockSpec((tm, N), lambda i, k: (i, 0)),
            scratch_shapes=[pltpu.VMEM((tm, N), jnp.float32)]),
        compiler_params=pltpu.CompilerParams(
            dimension_semantics=("parallel", "arbitrary"),
            vmem_limit_bytes=_vmem_limit(needed)),
    )(x, w, b.reshape(1, N), residual, gamma.reshape(1, N), beta.reshape(1, N))


# ------------------------------ LayerNorm (rows) -----------------------------

def _layernorm_kernel(x_ref, g_ref, b_ref, o_ref, *, eps):
    x = x_ref[...].astype(jnp.float32)
    mean = jnp.mean(x, axis=-1, keepdims=True)
    var = jnp.mean((x - mean) ** 2, axis=-1, keepdims=True)
    inv = jax.lax.rsqrt(var + eps)
    o_ref[...] = (((x - mean) * inv) * g_ref[...] + b_ref[...]).astype(o_ref.dtype)


def layernorm(x, g, b, eps=1e-12, out_dtype=jnp.bfloat16):
    M, H = x.shape
    # Modest tm -> more grid steps so v7x's 2 TensorCores both get work.
    tm = _pick_tile(M, 256, 8)
    return pl.pallas_call(
        functools.partial(_layernorm_kernel, eps=eps),
        out_shape=jax.ShapeDtypeStruct((M, H), out_dtype),
        grid=(M // tm,),
        in_specs=[pl.BlockSpec((tm, H), lambda i: (i, 0)),
                  pl.BlockSpec((1, H), lambda i: (0, 0)),
                  pl.BlockSpec((1, H), lambda i: (0, 0))],
        out_specs=pl.BlockSpec((tm, H), lambda i: (i, 0)),
        compiler_params=pltpu.CompilerParams(dimension_semantics=("parallel",)),
    )(x, g.reshape(1, H), b.reshape(1, H))


# ------------------------- multi-head self-attention -------------------------

def _attention_kernel(q_ref, k_ref, v_ref, bias_ref, o_ref, *, scale):
    # One (batch, head) pair per grid step.  Blocks: (1, 1, S, dh).
    q = q_ref[0, 0].astype(jnp.bfloat16)          # (S, dh)
    k = k_ref[0, 0].astype(jnp.bfloat16)
    v = v_ref[0, 0].astype(jnp.bfloat16)
    bias = bias_ref[0]                            # (1, S) additive key mask
    # scores = q @ k^T — bf16 MXU, f32 accumulation; softmax stats in f32.
    s = jax.lax.dot_general(q, k, (((1,), (1,)), ((), ())),
                            preferred_element_type=jnp.float32) * scale + bias
    m = jnp.max(s, axis=-1, keepdims=True)
    p = jnp.exp(s - m)
    l = jnp.sum(p, axis=-1, keepdims=True)
    ctx = jnp.dot(p.astype(jnp.bfloat16), v,      # probs in bf16 for the MXU
                  preferred_element_type=jnp.float32)
    # Normalize the (S, dh) context (not the (S, S) probs); EUP reciprocal.
    ctx = ctx * pl.reciprocal(l, approx=True)
    o_ref[0, 0] = ctx.astype(o_ref.dtype)         # direct per-head store


def attention_core(q, k, v, bias):
    """q/k/v: (B, nH, S, dh) head-major bf16; bias: (B, 1, S) f32.
    grid=(B, nH): per-step live set is one head's (S, S) scores; B*nH steps
    keep the pipeline (and v7x's 2 TensorCores) busy even at B=1-2."""
    # TODO(synk): for S >> 1024 replace with a flash-style KV-tiled kernel
    #             (online softmax) to bound the (S, S) VMEM live set.
    B, nH, S, dh = q.shape
    scale = 1.0 / (dh ** 0.5)
    qkv_spec = pl.BlockSpec((1, 1, S, dh), lambda b, h: (b, h, 0, 0))
    return pl.pallas_call(
        functools.partial(_attention_kernel, scale=scale),
        out_shape=jax.ShapeDtypeStruct((B, nH, S, dh), jnp.bfloat16),
        grid=(B, nH),
        in_specs=[qkv_spec, qkv_spec, qkv_spec,
                  pl.BlockSpec((1, 1, S), lambda b, h: (b, 0, 0))],
        out_specs=pl.BlockSpec((1, 1, S, dh), lambda b, h: (b, h, 0, 0)),
        compiler_params=pltpu.CompilerParams(
            dimension_semantics=("parallel", "parallel")),
    )(q, k, v, bias)


# --------------------------- model (glue + kernels) --------------------------

def init_params(key, *, vocab, max_pos, hidden, n_heads, ffn, n_layers, nb_classes):
    def nrm(k, shape, scale=0.02):
        return (scale * jax.random.normal(k, shape)).astype(jnp.float32)

    keys = iter(jax.random.split(key, 4 + 6 * n_layers + len(nb_classes)))
    params = {
        "n_heads": n_heads,
        "nb_classes": list(nb_classes),
        "tok_emb": nrm(next(keys), (vocab, hidden)),
        "pos_emb": nrm(next(keys), (max_pos, hidden)),
        "ln_emb_g": jnp.ones((hidden,), jnp.float32),
        "ln_emb_b": jnp.zeros((hidden,), jnp.float32),
        "layers": [],
    }
    for _ in range(n_layers):
        wq = nrm(next(keys), (hidden, hidden))
        wk = nrm(next(keys), (hidden, hidden))
        wv = nrm(next(keys), (hidden, hidden))
        layer = {
            # fused Q|K|V projection, weights stored bf16 for the MXU
            "w_qkv": jnp.concatenate([wq, wk, wv], axis=1).astype(jnp.bfloat16),
            "b_qkv": jnp.zeros((3 * hidden,), jnp.float32),
            "wo": nrm(next(keys), (hidden, hidden)).astype(jnp.bfloat16),
            "bo": jnp.zeros((hidden,), jnp.float32),
            "ln1_g": jnp.ones((hidden,), jnp.float32),
            "ln1_b": jnp.zeros((hidden,), jnp.float32),
            "w1": nrm(next(keys), (hidden, ffn)).astype(jnp.bfloat16),
            "b1": jnp.zeros((ffn,), jnp.float32),
            "w2": nrm(next(keys), (ffn, hidden)).astype(jnp.bfloat16),
            "b2": jnp.zeros((hidden,), jnp.float32),
            "ln2_g": jnp.ones((hidden,), jnp.float32),
            "ln2_b": jnp.zeros((hidden,), jnp.float32),
        }
        params["layers"].append(layer)

    # Classifier heads: one concatenated weight, lane-padded to a multiple of
    # 128 so the output store is unmasked; sliced per head in the wrapper.
    head_ws = [nrm(next(keys), (hidden, c)) for c in nb_classes]
    total = sum(nb_classes)
    padded = ((total + 127) // 128) * 128
    wc = jnp.pad(jnp.concatenate(head_ws, axis=1), ((0, 0), (0, padded - total)))
    params["head_w"] = wc.astype(jnp.bfloat16)
    params["head_b"] = jnp.zeros((padded,), jnp.float32)
    return params


def flaubert_classifier_forward(params, input_ids, attention_mask):
    B, S = input_ids.shape
    H = params["tok_emb"].shape[1]
    nH = params["n_heads"]
    dh = H // nH

    # Embeddings (gather is glue) + embedding LayerNorm (Pallas, bf16 out).
    h = params["tok_emb"][input_ids] + params["pos_emb"][jnp.arange(S)][None, :, :]
    h2 = layernorm(h.reshape(B * S, H), params["ln_emb_g"], params["ln_emb_b"])

    # Additive key-padding mask bias: 0 for valid tokens, -1e9 for padding.
    bias = ((1.0 - attention_mask.astype(jnp.float32)) * -1e9).reshape(B, 1, S)

    for layer in params["layers"]:
        # Fused QKV projection (bf16 out) + XLA head-major split/transpose.
        qkv = dense(h2, layer["w_qkv"], layer["b_qkv"])            # (B*S, 3H) bf16
        qkv = qkv.reshape(B, S, 3, nH, dh)
        q = jnp.transpose(qkv[:, :, 0], (0, 2, 1, 3))              # (B, nH, S, dh)
        k = jnp.transpose(qkv[:, :, 1], (0, 2, 1, 3))
        v = jnp.transpose(qkv[:, :, 2], (0, 2, 1, 3))
        ctx = attention_core(q, k, v, bias)                        # (B, nH, S, dh)
        ctx = jnp.transpose(ctx, (0, 2, 1, 3)).reshape(B * S, H)   # (B*S, H) bf16
        # Output projection fused with residual add + LayerNorm.
        h2 = dense_add_layernorm(ctx, layer["wo"], layer["bo"],
                                 h2, layer["ln1_g"], layer["ln1_b"])
        # Feed-forward: gelu fused into w1 epilogue; w2 fused with add+LN.
        ff = dense(h2, layer["w1"], layer["b1"], activation="gelu")
        h2 = dense_add_layernorm(ff, layer["w2"], layer["b2"],
                                 h2, layer["ln2_g"], layer["ln2_b"])

    hidden = h2.reshape(B, S, H)
    pooled = hidden[:, 0, :]                      # last_hidden_state[:, 0, :]
    # Pad the batch to the sublane granule so the tiny head matmul is unmasked.
    Mp = max(8, ((B + 7) // 8) * 8)
    pooled_p = jnp.pad(pooled, ((0, Mp - B), (0, 0)))
    logits_all = dense(pooled_p, params["head_w"], params["head_b"],
                       out_dtype=jnp.float32)[:B]                  # (B, padded)
    logits, off = [], 0
    for c in params["nb_classes"]:
        logits.append(logits_all[:, off:off + c])
        off += c
    return logits


# ---------------------------------- driver -----------------------------------

if __name__ == "__main__":
    B, S, H, NH, FFN, LAYERS, VOCAB = 2, 8, 32, 4, 128, 2, 64
    NB_CLASSES = [3, 5]

    key = jax.random.PRNGKey(0)
    k_params, k_ids = jax.random.split(key)

    params = init_params(k_params, vocab=VOCAB, max_pos=S, hidden=H,
                         n_heads=NH, ffn=FFN, n_layers=LAYERS,
                         nb_classes=NB_CLASSES)

    input_ids = jax.random.randint(k_ids, (B, S), 0, VOCAB, dtype=jnp.int32)
    attention_mask = jnp.array([[1, 1, 1, 1, 1, 1, 1, 1],
                                [1, 1, 1, 1, 1, 1, 0, 0]], dtype=jnp.int32)

    logits = flaubert_classifier_forward(params, input_ids, attention_mask)
    for lg in logits:
        jax.block_until_ready(lg)

    assert logits[0].shape == (B, NB_CLASSES[0])
    assert logits[1].shape == (B, NB_CLASSES[1])
    print("KERNEL_OK")
</pallas_src>

<mosaic_0001>
module attributes {stable_mosaic.version = 11 : i64} {
  func.func @_layernorm_kernel(%arg0: i32, %arg1: memref<16x32xf32, #tpu.memory_space<vmem>>, %arg2: memref<1x32xf32, #tpu.memory_space<vmem>>, %arg3: memref<1x32xf32, #tpu.memory_space<vmem>>, %arg4: memref<16x32xbf16, #tpu.memory_space<vmem>>) attributes {dimension_semantics = [#tpu.dimension_semantics<parallel>], iteration_bounds = array<i64: 1>, scalar_prefetch = 0 : i64, scratch_operands = 0 : i64, tpu.core_type = #tpu.core_type<tc>, window_params = [{transform_indices = @transform_0, window_bounds = array<i64: 16, 32>}, {pipeline_mode = #tpu.pipeline_mode<synchronous>, transform_indices = @transform_1, window_bounds = array<i64: 1, 32>}, {pipeline_mode = #tpu.pipeline_mode<synchronous>, transform_indices = @transform_2, window_bounds = array<i64: 1, 32>}, {transform_indices = @transform_3, window_bounds = array<i64: 16, 32>}]} {
    %c0 = arith.constant 0 : index
    %c0_0 = arith.constant 0 : index
    %0 = vector.load %arg1[%c0, %c0_0] : memref<16x32xf32, #tpu.memory_space<vmem>>, vector<16x32xf32>
    %cst = arith.constant dense<0.000000e+00> : vector<16xf32>
    %1 = vector.multi_reduction <add>, %0, %cst [1] : vector<16x32xf32> to vector<16xf32>
    %2 = vector.shape_cast %1 : vector<16xf32> to vector<16x1xf32>
    %cst_1 = arith.constant 3.200000e+01 : f32
    %3 = vector.broadcast %cst_1 : f32 to vector<16x1xf32>
    %4 = arith.divf %2, %3 : vector<16x1xf32>
    %5 = vector.broadcast %4 : vector<16x1xf32> to vector<16x32xf32>
    %6 = arith.subf %0, %5 : vector<16x32xf32>
    %7 = arith.mulf %6, %6 : vector<16x32xf32>
    %cst_2 = arith.constant dense<0.000000e+00> : vector<16xf32>
    %8 = vector.multi_reduction <add>, %7, %cst_2 [1] : vector<16x32xf32> to vector<16xf32>
    %9 = vector.shape_cast %8 : vector<16xf32> to vector<16x1xf32>
    %cst_3 = arith.constant 3.200000e+01 : f32
    %10 = vector.broadcast %cst_3 : f32 to vector<16x1xf32>
    %11 = arith.divf %9, %10 : vector<16x1xf32>
    %cst_4 = arith.constant 9.99999996E-13 : f32
    %12 = vector.broadcast %cst_4 : f32 to vector<16x1xf32>
    %13 = arith.addf %11, %12 : vector<16x1xf32>
    %14 = math.rsqrt %13 : vector<16x1xf32>
    %15 = vector.broadcast %4 : vector<16x1xf32> to vector<16x32xf32>
    %16 = arith.subf %0, %15 : vector<16x32xf32>
    %17 = vector.broadcast %14 : vector<16x1xf32> to vector<16x32xf32>
    %18 = arith.mulf %16, %17 : vector<16x32xf32>
    %c0_5 = arith.constant 0 : index
    %c0_6 = arith.constant 0 : index
    %19 = vector.load %arg2[%c0_5, %c0_6] : memref<1x32xf32, #tpu.memory_space<vmem>>, vector<1x32xf32>
    %20 = vector.broadcast %19 : vector<1x32xf32> to vector<16x32xf32>
    %21 = arith.mulf %18, %20 : vector<16x32xf32>
    %c0_7 = arith.constant 0 : index
    %c0_8 = arith.constant 0 : index
    %22 = vector.load %arg3[%c0_7, %c0_8] : memref<1x32xf32, #tpu.memory_space<vmem>>, vector<1x32xf32>
    %23 = vector.broadcast %22 : vector<1x32xf32> to vector<16x32xf32>
    %24 = arith.addf %21, %23 : vector<16x32xf32>
    %25 = arith.truncf %24 : vector<16x32xf32> to vector<16x32xbf16>
    %c0_9 = arith.constant 0 : index
    %c0_10 = arith.constant 0 : index
    %26 = vector.load %arg4[%c0_9, %c0_10] : memref<16x32xbf16, #tpu.memory_space<vmem>>, vector<16x32xbf16>
    tpu.vector_store %arg4[%c0_9, %c0_10], %25 {strides = array<i32>} : memref<16x32xbf16, #tpu.memory_space<vmem>>, vector<16x32xbf16>,
    return
  }
  func.func @transform_0(%arg0: i32) -> (i32, i32) {
    %c0_i32 = arith.constant 0 : i32
    %c0_i32_0 = arith.constant 0 : i32
    return %arg0, %c0_i32 : i32, i32
  }
  func.func @transform_1(%arg0: i32) -> (i32, i32) {
    %c0_i32 = arith.constant 0 : i32
    %c0_i32_0 = arith.constant 0 : i32
    %c0_i32_1 = arith.constant 0 : i32
    return %c0_i32, %c0_i32_0 : i32, i32
  }
  func.func @transform_2(%arg0: i32) -> (i32, i32) {
    %c0_i32 = arith.constant 0 : i32
    %c0_i32_0 = arith.constant 0 : i32
    %c0_i32_1 = arith.constant 0 : i32
    return %c0_i32, %c0_i32_0 : i32, i32
  }
  func.func @transform_3(%arg0: i32) -> (i32, i32) {
    %c0_i32 = arith.constant 0 : i32
    %c0_i32_0 = arith.constant 0 : i32
    return %arg0, %c0_i32 : i32, i32
  }
}

</mosaic_0001>

<bundles_post_ra>
// kernel: tpu_custom_call.1
= control target key start
LH: loop header
LB: loop body
LE: loop exit
PB: predicated region body
PF: predicated region fallthrough
CT: control target
= control target key end

     0   :  { %8 = vsyncpa [#allocation3], 0  ;;  %s229_s0 = inlined_call_operand.hbm [shape: f32[16,32], index: 0, kind: input, shape index: {}]   ;;  %s230_s1 = inlined_call_operand.vmem [shape: f32[1,32], index: 1, kind: input, shape index: {}]   ;;  %s231_s2 = inlined_call_operand.vmem [shape: f32[1,32], index: 2, kind: input, shape index: {}]   ;;  %s232_s3 = inlined_call_operand.hbm [shape: bf16[16,32], index: 3, kind: output, shape index: {}]  }
   0x1   :  { %9 = vsyncpa [#allocation4], 0  ;;  %s169_s12 = smov [#allocation2]   ;;  %s121_s16 = scalar_lea.hbm %s229_s0, 256 }
   0x2   :  { %s15_s13 = sshll.u32 %s169_s12, 4  ;;  %p122_p0 = scmp.ne.s32.totalorder %s229_s0, %s121_s16  ;;  %s16_s13 = int_to_ptr.vmem [resolvable:$true] %s15_s13 }
   0x3   :  { %p125_p1 = scmp.lt.u32.totalorder %s121_s16, %s229_s0 }
   0x5   :  { %p127_p2 = pnand %p125_p1, %p122_p0 }
   0x7   :  { %130 = shalt.err (!%p127_p2)
}
   0x8   :  { %s131_s21 = scalar_lea.vmem %s16_s13, 256  ;;  %p136_p4 = scmp.lt.s32.totalorder %s16_s13, %s16_s13 }
   0x9   :  { %p132_p3 = scmp.ne.s32.totalorder %s16_s13, %s131_s21  ;;  %p137_p5 = scmp.lt.s32.totalorder %s131_s21, %s131_s21 }
   0xb   :  { %p138_p6 = por %p137_p5, %p136_p4 }
   0xd   :  { %p139_p7 = pnand %p138_p6, %p132_p3 }
   0xf   :  { %142 = shalt.err (!%p139_p7)
}
  0x10   :  { %s170_s22 = smov 128   ;;  %s171_s23 = smov 8  }
  0x11   :  { %21 = dma.hbm_to_vmem [thread:$0]  %s229_s0, 256, %s16_s13, [#allocation3], %s170_s22, %s170_s22, %s171_s23  }
  0x12   :  { %165 = dma.done.wait [#allocation3], 256  }
  0x13   :  { %166 = vsyncadd [#allocation3], 4294967040  ;;  %vm31_vm0 = vcmask 261120   ;;  %v29_v0 = vld [vmem:[#allocation2] sm:$0xff]  ;;  %v30_v1 = vld [vmem:[#allocation2 + $0x8] sm:$0xff]  ;;  %vm85_vm1 = vcmask 257024  }
  0x14   :  { %v32_v2 = vsel %vm31_vm0, %v29_v0, 0.0  ;;  %v35_v3 = vsel %vm31_vm0, %v30_v1, 0.0  ;;  %v105_v21 = vld [vmem:[%s230_s1] ss:$0 sm:$0xff]  ;;  %s172_s29 = smov [#allocation5]  }
  0x15   :  { %33 = vadd.xlane.f32.xlu0 %v32_v2  ;;  %v106_v23 = vld [vmem:[%s231_s2] ss:$0 sm:$0xff]  ;;  %s93_s30 = sshll.u32 %s172_s29, 4  ;;  %s94_s30 = int_to_ptr.vmem [resolvable:$true] %s93_s30 }
  0x16   :  { %s143_s1 = scalar_lea.vmem %s94_s30, 128  ;;  %p148_p9 = scmp.lt.s32.totalorder %s94_s30, %s94_s30 }
  0x17   :  { %p144_p8 = scmp.ne.s32.totalorder %s94_s30, %s143_s1  ;;  %p149_p10 = scmp.lt.s32.totalorder %s143_s1, %s143_s1 }
  0x19   :  { %36 = vadd.xlane.f32.xlu0 %v35_v3  ;;  %p150_p11 = por %p149_p10, %p148_p9 }
  0x1b   :  { %p151_p12 = pnand %p150_p11, %p144_p8 }
  0xa2   :  { %v34_v4 = vpop.xlane.xlu0 %33 }
  0xa3   :  { %v39_v5 = vmul.f32 0.03125, %v34_v4 }
  0xa5   :  { %v41_v6 = vsub.f32 %v29_v0, %v39_v5 }
  0xa6   :  { %v37_v7 = vpop.xlane.xlu0 %36 }
  0xa7   :  { %v40_v8 = vmul.f32 0.03125, %v37_v7  ;;  %v43_v9 = vmul.f32 %v41_v6, %v41_v6 }
  0xa9   :  { %v42_v10 = vsub.f32 %v30_v1, %v40_v8  ;;  %v45_v11 = vsel %vm31_vm0, %v43_v9, 0.0 }
  0xaa   :  { %46 = vadd.xlane.f32.xlu1 %v45_v11 }
  0xab   :  { %v44_v12 = vmul.f32 %v42_v10, %v42_v10 }
  0xad   :  { %v48_v13 = vsel %vm31_vm0, %v44_v12, 0.0 }
  0xae   :  { %49 = vadd.xlane.f32.xlu1 %v48_v13 }
 0x137   :  { %v47_v14 = vpop.xlane.xlu1 %46 }
 0x138   :  { %v51_v15 = vmul.f32 0.03125, %v47_v14 }
 0x13a   :  { %v53_v16 = vadd.f32 1e-12, %v51_v15 }
 0x13b   :  { %v50_v17 = vpop.xlane.xlu1 %49 }
 0x13c   :  { %117 = vrsqrt.f32 %v53_v16  ;;  %v52_v18 = vmul.f32 0.03125, %v50_v17 }
 0x13e   :  { %v54_v19 = vadd.f32 1e-12, %v52_v18 }
 0x140   :  { %119 = vrsqrt.f32 %v54_v19 }
 0x146   :  { %v118_v20 = vpop.eup %117 }
 0x147   :  { %v57_v22 = vmul.f32 %v118_v20, %v41_v6 }
 0x149   :  { %v66_v24 = vmul.f32 %v105_v21, %v57_v22 }
 0x14a   :  { %v120_v25 = vpop.eup %119 }
 0x14b   :  { %v58_v26 = vmul.f32 %v120_v25, %v42_v10  ;;  %v75_v27 = vadd.f32 %v106_v23, %v66_v24 }
 0x14d   :  { %v67_v28 = vmul.f32 %v105_v21, %v58_v26  ;;  %v109_v29 = vpack.c.bf16 %v75_v27, %v75_v27 }
 0x14f   :  { %v76_v30 = vadd.f32 %v106_v23, %v67_v28  ;;  %86 = vst.msk [vmem:[#allocation5] sm:$0xf] %vm85_vm1, %v109_v29 }
 0x151   :  { %v110_v31 = vpack.c.bf16 %v76_v30, %v76_v30 }
 0x153   :  { %87 = vst.msk [vmem:[#allocation5 + $0x4] sm:$0xf] %vm85_vm1, %v110_v31 }
 0x154   :  { %154 = shalt.err (!%p151_p12)
}
 0x155   :  { %s155_s5 = scalar_lea.hbm %s232_s3, 128 }
 0x156   :  { %p156_p13 = scmp.ne.s32.totalorder %s232_s3, %s155_s5  ;;  %p159_p0 = scmp.lt.u32.totalorder %s155_s5, %s232_s3 }
 0x158   :  { %p161_p1 = pnand %p159_p0, %p156_p13 }
 0x15a   :  { %164 = shalt.err (!%p161_p1)
}
 0x15b   :  { %s173_s10 = smov 64   ;;  %s174_s11 = smov 4  }
 0x15c   :  { %99 = dma.vmem_to_hbm [thread:$0]  %s94_s30, 128, %s232_s3, [#allocation4], %s173_s10, %s173_s10, %s174_s11  }
 0x15d   :  { %167 = dma.done.wait [#allocation4], 128  }
 0x15e   :  { %168 = vsyncadd [#allocation4], 4294967168 }
 0x15f   :  { %103 = vsyncpa [#allocation3], 1 }
 0x160   :  { %104 = vsyncpa [#allocation4], 1 }

</bundles_post_ra>
